<compile_context>
chip_gen: v5e
topology: v5e:2x2
jax: 0.10.0
libtpu: 0.0.40
codegen_flags: <defaults>
</compile_context>

<pallas_src>
import jax
import jax.numpy as jnp
from jax.experimental import pallas as pl
from jax.experimental.pallas import tpu as pltpu


# ----------------------------------------------------------------------------
# Packed-parameter slab layout: each param in its own 8-row-aligned block of a
# single (SLAB_ROWS, 128) f32 array.  Weights are stored pre-transposed to
# (in, out); biases as (1, out).  All offsets are static Python ints.
# ----------------------------------------------------------------------------
PARAM_SHAPES = (
    ("w1", (5, 20)), ("b1", (1, 20)),      # encoder1_1
    ("w2", (20, 20)), ("b2", (1, 20)),     # encoder1_2
    ("w3", (20, 3)), ("b3", (1, 3)),       # encoder1_3
    ("wx1", (3, 20)), ("bx1", (1, 20)),    # linear_x_1
    ("wx2", (20, 20)), ("bx2", (1, 20)),   # linear_x_2
    ("wx3", (20, 5)), ("bx3", (1, 5)),     # linear_x_3
)
_SHAPE_OF = dict(PARAM_SHAPES)


def _layout():
    offs, row = {}, 0
    for name, (r, _) in PARAM_SHAPES:
        offs[name] = row
        row += -(-r // 8) * 8            # round rows up to a sublane multiple
    return offs, row


PARAM_OFFSETS, SLAB_ROWS = _layout()
SLAB_COLS = 128


# ----------------------------------------------------------------------------
# Kernel: whole MLP in one grid-less invocation (entire working set < 100 KiB).
# ----------------------------------------------------------------------------
def linearnet_kernel(x_ref, p_ref, enc0_ref, loss_ref):
    x = x_ref[...]                                            # (N, 5) f32

    def param(name):
        r, c = _SHAPE_OF[name]
        off = PARAM_OFFSETS[name]
        return p_ref[off:off + r, 0:c]                        # static slice

    # ---- encoder layer 1: Linear(5,20) + tanh  (K=5 -> VPU broadcast form)
    w1 = param("w1")
    h = param("b1")                                           # (1, 20)
    for k in range(5):
        h = h + x[:, k:k + 1] * w1[k:k + 1, :]                # (N, 20)
    h = jnp.tanh(h)

    # ---- encoder layer 2: Linear(20,20) + tanh  (MXU)
    h = jnp.tanh(jnp.dot(h, param("w2"),
                         preferred_element_type=jnp.float32) + param("b2"))

    # ---- encoder layer 3: Linear(20,3)  (MXU)
    enc = jnp.dot(h, param("w3"),
                  preferred_element_type=jnp.float32) + param("b3")    # (N, 3)
    enc0_ref[...] = enc[0:1, :]          # only row 0 is consumed by the caller

    # ---- decoder layer 1: Linear(3,20) + ReLU  (K=3 -> VPU broadcast form)
    wx1 = param("wx1")
    d = param("bx1")
    for k in range(3):
        d = d + enc[:, k:k + 1] * wx1[k:k + 1, :]
    d = jnp.maximum(d, 0.0)

    # ---- decoder layers 2/3  (MXU)
    d = jnp.maximum(jnp.dot(d, param("wx2"),
                            preferred_element_type=jnp.float32) + param("bx2"),
                    0.0)
    l2 = jnp.dot(d, param("wx3"),
                 preferred_element_type=jnp.float32) + param("bx3")    # (N, 5)

    # torch.norm(l2 - x, p=2)**2  (Frobenius).  The 100 decoder passes are
    # identical, so loss2_sum == 100*sq and loss2_sum/100 == sq (not bit-exact
    # with the repeated-add chain; ~1 ulp, accepted).
    diff = l2 - x
    sq = jnp.sum(diff * diff)
    loss_ref[0, 0] = sq                                       # == loss2_sum/100


# ----------------------------------------------------------------------------
# Wrapper
# ----------------------------------------------------------------------------
def make_params(key):
    """Deterministic init matching the torch module's layer shapes.
    Weights are returned pre-transposed to (in, out); biases as (1, out)."""
    params = []
    for i, (_, (fan_in, fan_out)) in enumerate(PARAM_SHAPES[::2]):
        kw, kb = jax.random.split(jax.random.fold_in(key, i))
        bound = 1.0 / jnp.sqrt(jnp.float32(fan_in))
        w = jax.random.uniform(kw, (fan_in, fan_out), jnp.float32, -bound, bound)
        b = jax.random.uniform(kb, (1, fan_out), jnp.float32, -bound, bound)
        params.append(w)
        params.append(b)
    return params


def pack_params(params):
    """Pack all 12 params into one zero-padded (SLAB_ROWS, 128) f32 slab."""
    slab = jnp.zeros((SLAB_ROWS, SLAB_COLS), jnp.float32)
    for (name, (r, c)), p in zip(PARAM_SHAPES, params):
        off = PARAM_OFFSETS[name]
        slab = slab.at[off:off + r, 0:c].set(p.astype(jnp.float32))
    return slab


def linearnet_forward(x, u0, packed_params):
    # u0 is accepted for signature parity but (as in the torch forward) unused.
    del u0
    vmem = pl.BlockSpec(memory_space=pltpu.MemorySpace.VMEM)
    smem = pl.BlockSpec(memory_space=pltpu.MemorySpace.SMEM)

    enc0, loss = pl.pallas_call(
        linearnet_kernel,
        out_shape=(
            jax.ShapeDtypeStruct((1, 3), jnp.float32),   # encoder row 0
            jax.ShapeDtypeStruct((1, 1), jnp.float32),   # loss2_sum / 100
        ),
        in_specs=[vmem, vmem],
        out_specs=(vmem, smem),
    )(x, packed_params)

    loss21 = loss[0, 0]
    loss50 = loss21 * 2.0            # (s/100)*2 == s/50 exactly in fp32
    return (loss21, enc0[0, 0], enc0[0, 2], enc0[0, 1], loss50)


if __name__ == "__main__":
    key = jax.random.PRNGKey(0)
    kx, kp = jax.random.split(key)

    batch = 2
    x = jax.random.normal(kx, (batch, 5), jnp.float32)
    u0 = jnp.array([1], dtype=jnp.int32)   # unused by forward (as in torch)
    packed = pack_params(make_params(kp))

    out = jax.jit(linearnet_forward)(x, u0, packed)
    out = jax.block_until_ready(out)

    loss, e00, e02, e01, loss50 = out
    assert all(jnp.isfinite(v) for v in out)
    print("KERNEL_OK")
</pallas_src>

<mosaic_0001>
module attributes {stable_mosaic.version = 11 : i64} {
  func.func @linearnet_kernel(%arg0: memref<2x5xf32, #tpu.memory_space<vmem>>, %arg1: memref<160x128xf32, #tpu.memory_space<vmem>>, %arg2: memref<1x3xf32, #tpu.memory_space<vmem>>, %arg3: memref<1x1xf32, #tpu.memory_space<smem>>) attributes {dimension_semantics = [], scalar_prefetch = 0 : i64, scratch_operands = 0 : i64, tpu.core_type = #tpu.core_type<tc>} {
    %c0 = arith.constant 0 : index
    %c0_0 = arith.constant 0 : index
    %0 = vector.load %arg0[%c0, %c0_0] : memref<2x5xf32, #tpu.memory_space<vmem>>, vector<2x5xf32>
    %c0_1 = arith.constant 0 : index
    %c0_2 = arith.constant 0 : index
    %1 = vector.load %arg1[%c0_1, %c0_2] : memref<160x128xf32, #tpu.memory_space<vmem>>, vector<5x20xf32>
    %c8 = arith.constant 8 : index
    %c0_3 = arith.constant 0 : index
    %2 = vector.load %arg1[%c8, %c0_3] : memref<160x128xf32, #tpu.memory_space<vmem>>, vector<1x20xf32>
    %3 = vector.extract_strided_slice %0 {offsets = [0, 0], sizes = [2, 1], strides = [1, 1]} : vector<2x5xf32> to vector<2x1xf32>
    %4 = vector.extract_strided_slice %1 {offsets = [0, 0], sizes = [1, 20], strides = [1, 1]} : vector<5x20xf32> to vector<1x20xf32>
    %5 = vector.broadcast %3 : vector<2x1xf32> to vector<2x20xf32>
    %6 = vector.broadcast %4 : vector<1x20xf32> to vector<2x20xf32>
    %7 = arith.mulf %5, %6 : vector<2x20xf32>
    %8 = vector.broadcast %2 : vector<1x20xf32> to vector<2x20xf32>
    %9 = arith.addf %8, %7 : vector<2x20xf32>
    %10 = vector.extract_strided_slice %0 {offsets = [0, 1], sizes = [2, 1], strides = [1, 1]} : vector<2x5xf32> to vector<2x1xf32>
    %11 = vector.extract_strided_slice %1 {offsets = [1, 0], sizes = [1, 20], strides = [1, 1]} : vector<5x20xf32> to vector<1x20xf32>
    %12 = vector.broadcast %10 : vector<2x1xf32> to vector<2x20xf32>
    %13 = vector.broadcast %11 : vector<1x20xf32> to vector<2x20xf32>
    %14 = arith.mulf %12, %13 : vector<2x20xf32>
    %15 = arith.addf %9, %14 : vector<2x20xf32>
    %16 = vector.extract_strided_slice %0 {offsets = [0, 2], sizes = [2, 1], strides = [1, 1]} : vector<2x5xf32> to vector<2x1xf32>
    %17 = vector.extract_strided_slice %1 {offsets = [2, 0], sizes = [1, 20], strides = [1, 1]} : vector<5x20xf32> to vector<1x20xf32>
    %18 = vector.broadcast %16 : vector<2x1xf32> to vector<2x20xf32>
    %19 = vector.broadcast %17 : vector<1x20xf32> to vector<2x20xf32>
    %20 = arith.mulf %18, %19 : vector<2x20xf32>
    %21 = arith.addf %15, %20 : vector<2x20xf32>
    %22 = vector.extract_strided_slice %0 {offsets = [0, 3], sizes = [2, 1], strides = [1, 1]} : vector<2x5xf32> to vector<2x1xf32>
    %23 = vector.extract_strided_slice %1 {offsets = [3, 0], sizes = [1, 20], strides = [1, 1]} : vector<5x20xf32> to vector<1x20xf32>
    %24 = vector.broadcast %22 : vector<2x1xf32> to vector<2x20xf32>
    %25 = vector.broadcast %23 : vector<1x20xf32> to vector<2x20xf32>
    %26 = arith.mulf %24, %25 : vector<2x20xf32>
    %27 = arith.addf %21, %26 : vector<2x20xf32>
    %28 = vector.extract_strided_slice %0 {offsets = [0, 4], sizes = [2, 1], strides = [1, 1]} : vector<2x5xf32> to vector<2x1xf32>
    %29 = vector.extract_strided_slice %1 {offsets = [4, 0], sizes = [1, 20], strides = [1, 1]} : vector<5x20xf32> to vector<1x20xf32>
    %30 = vector.broadcast %28 : vector<2x1xf32> to vector<2x20xf32>
    %31 = vector.broadcast %29 : vector<1x20xf32> to vector<2x20xf32>
    %32 = arith.mulf %30, %31 : vector<2x20xf32>
    %33 = arith.addf %27, %32 : vector<2x20xf32>
    %34 = math.tanh %33 : vector<2x20xf32>
    %c16 = arith.constant 16 : index
    %c0_4 = arith.constant 0 : index
    %35 = vector.load %arg1[%c16, %c0_4] : memref<160x128xf32, #tpu.memory_space<vmem>>, vector<20x20xf32>
    %cst = arith.constant dense<0.000000e+00> : vector<2x20xf32>
    %36 = tpu.matmul %34, %35, %cst {dimension_numbers = #tpu.dot_dimension_numbers<[1], [0], [0], [1], [0, 0, 1, 1], [], []>} : vector<2x20xf32>, vector<20x20xf32>, vector<2x20xf32> -> vector<2x20xf32>
    %c40 = arith.constant 40 : index
    %c0_5 = arith.constant 0 : index
    %37 = vector.load %arg1[%c40, %c0_5] : memref<160x128xf32, #tpu.memory_space<vmem>>, vector<1x20xf32>
    %38 = vector.broadcast %37 : vector<1x20xf32> to vector<2x20xf32>
    %39 = arith.addf %36, %38 : vector<2x20xf32>
    %40 = math.tanh %39 : vector<2x20xf32>
    %c48 = arith.constant 48 : index
    %c0_6 = arith.constant 0 : index
    %41 = vector.load %arg1[%c48, %c0_6] : memref<160x128xf32, #tpu.memory_space<vmem>>, vector<20x3xf32>
    %cst_7 = arith.constant dense<0.000000e+00> : vector<2x3xf32>
    %42 = tpu.matmul %40, %41, %cst_7 {dimension_numbers = #tpu.dot_dimension_numbers<[1], [0], [0], [1], [0, 0, 1, 1], [], []>} : vector<2x20xf32>, vector<20x3xf32>, vector<2x3xf32> -> vector<2x3xf32>
    %c72 = arith.constant 72 : index
    %c0_8 = arith.constant 0 : index
    %43 = vector.load %arg1[%c72, %c0_8] : memref<160x128xf32, #tpu.memory_space<vmem>>, vector<1x3xf32>
    %44 = vector.broadcast %43 : vector<1x3xf32> to vector<2x3xf32>
    %45 = arith.addf %42, %44 : vector<2x3xf32>
    %46 = vector.extract_strided_slice %45 {offsets = [0, 0], sizes = [1, 3], strides = [1, 1]} : vector<2x3xf32> to vector<1x3xf32>
    %c0_9 = arith.constant 0 : index
    %c0_10 = arith.constant 0 : index
    %47 = vector.load %arg2[%c0_9, %c0_10] : memref<1x3xf32, #tpu.memory_space<vmem>>, vector<1x3xf32>
    tpu.vector_store %arg2[%c0_9, %c0_10], %46 {strides = array<i32>} : memref<1x3xf32, #tpu.memory_space<vmem>>, vector<1x3xf32>,
    %c80 = arith.constant 80 : index
    %c0_11 = arith.constant 0 : index
    %48 = vector.load %arg1[%c80, %c0_11] : memref<160x128xf32, #tpu.memory_space<vmem>>, vector<3x20xf32>
    %c88 = arith.constant 88 : index
    %c0_12 = arith.constant 0 : index
    %49 = vector.load %arg1[%c88, %c0_12] : memref<160x128xf32, #tpu.memory_space<vmem>>, vector<1x20xf32>
    %50 = vector.extract_strided_slice %45 {offsets = [0, 0], sizes = [2, 1], strides = [1, 1]} : vector<2x3xf32> to vector<2x1xf32>
    %51 = vector.extract_strided_slice %48 {offsets = [0, 0], sizes = [1, 20], strides = [1, 1]} : vector<3x20xf32> to vector<1x20xf32>
    %52 = vector.broadcast %50 : vector<2x1xf32> to vector<2x20xf32>
    %53 = vector.broadcast %51 : vector<1x20xf32> to vector<2x20xf32>
    %54 = arith.mulf %52, %53 : vector<2x20xf32>
    %55 = vector.broadcast %49 : vector<1x20xf32> to vector<2x20xf32>
    %56 = arith.addf %55, %54 : vector<2x20xf32>
    %57 = vector.extract_strided_slice %45 {offsets = [0, 1], sizes = [2, 1], strides = [1, 1]} : vector<2x3xf32> to vector<2x1xf32>
    %58 = vector.extract_strided_slice %48 {offsets = [1, 0], sizes = [1, 20], strides = [1, 1]} : vector<3x20xf32> to vector<1x20xf32>
    %59 = vector.broadcast %57 : vector<2x1xf32> to vector<2x20xf32>
    %60 = vector.broadcast %58 : vector<1x20xf32> to vector<2x20xf32>
    %61 = arith.mulf %59, %60 : vector<2x20xf32>
    %62 = arith.addf %56, %61 : vector<2x20xf32>
    %63 = vector.extract_strided_slice %45 {offsets = [0, 2], sizes = [2, 1], strides = [1, 1]} : vector<2x3xf32> to vector<2x1xf32>
    %64 = vector.extract_strided_slice %48 {offsets = [2, 0], sizes = [1, 20], strides = [1, 1]} : vector<3x20xf32> to vector<1x20xf32>
    %65 = vector.broadcast %63 : vector<2x1xf32> to vector<2x20xf32>
    %66 = vector.broadcast %64 : vector<1x20xf32> to vector<2x20xf32>
    %67 = arith.mulf %65, %66 : vector<2x20xf32>
    %68 = arith.addf %62, %67 : vector<2x20xf32>
    %cst_13 = arith.constant 0.000000e+00 : f32
    %69 = vector.broadcast %cst_13 : f32 to vector<2x20xf32>
    %70 = arith.maximumf %68, %69 : vector<2x20xf32>
    %c96 = arith.constant 96 : index
    %c0_14 = arith.constant 0 : index
    %71 = vector.load %arg1[%c96, %c0_14] : memref<160x128xf32, #tpu.memory_space<vmem>>, vector<20x20xf32>
    %cst_15 = arith.constant dense<0.000000e+00> : vector<2x20xf32>
    %72 = tpu.matmul %70, %71, %cst_15 {dimension_numbers = #tpu.dot_dimension_numbers<[1], [0], [0], [1], [0, 0, 1, 1], [], []>} : vector<2x20xf32>, vector<20x20xf32>, vector<2x20xf32> -> vector<2x20xf32>
    %c120 = arith.constant 120 : index
    %c0_16 = arith.constant 0 : index
    %73 = vector.load %arg1[%c120, %c0_16] : memref<160x128xf32, #tpu.memory_space<vmem>>, vector<1x20xf32>
    %74 = vector.broadcast %73 : vector<1x20xf32> to vector<2x20xf32>
    %75 = arith.addf %72, %74 : vector<2x20xf32>
    %cst_17 = arith.constant 0.000000e+00 : f32
    %76 = vector.broadcast %cst_17 : f32 to vector<2x20xf32>
    %77 = arith.maximumf %75, %76 : vector<2x20xf32>
    %c128 = arith.constant 128 : index
    %c0_18 = arith.constant 0 : index
    %78 = vector.load %arg1[%c128, %c0_18] : memref<160x128xf32, #tpu.memory_space<vmem>>, vector<20x5xf32>
    %cst_19 = arith.constant dense<0.000000e+00> : vector<2x5xf32>
    %79 = tpu.matmul %77, %78, %cst_19 {dimension_numbers = #tpu.dot_dimension_numbers<[1], [0], [0], [1], [0, 0, 1, 1], [], []>} : vector<2x20xf32>, vector<20x5xf32>, vector<2x5xf32> -> vector<2x5xf32>
    %c152 = arith.constant 152 : index
    %c0_20 = arith.constant 0 : index
    %80 = vector.load %arg1[%c152, %c0_20] : memref<160x128xf32, #tpu.memory_space<vmem>>, vector<1x5xf32>
    %81 = vector.broadcast %80 : vector<1x5xf32> to vector<2x5xf32>
    %82 = arith.addf %79, %81 : vector<2x5xf32>
    %83 = arith.subf %82, %0 : vector<2x5xf32>
    %84 = arith.mulf %83, %83 : vector<2x5xf32>
    %85 = vector.shape_cast %84 : vector<2x5xf32> to vector<1x2x5xf32>
    %cst_21 = arith.constant dense<0.000000e+00> : vector<1xf32>
    %86 = vector.multi_reduction <add>, %85, %cst_21 [1, 2] : vector<1x2x5xf32> to vector<1xf32>
    %87 = vector.shape_cast %86 : vector<1xf32> to vector<1x1x1xf32>
    %88 = vector.extract %87[0, 0, 0] : f32 from vector<1x1x1xf32>
    %c0_22 = arith.constant 0 : index
    %c0_23 = arith.constant 0 : index
    %89 = memref.load %arg3[%c0_22, %c0_23] : memref<1x1xf32, #tpu.memory_space<smem>>
    memref.store %88, %arg3[%c0_22, %c0_23] : memref<1x1xf32, #tpu.memory_space<smem>>
    return
  }
}

</mosaic_0001>

<bundles_post_ra>
// kernel: linearnet_forward.1
= control target key start
LH: loop header
LB: loop body
LE: loop exit
PB: predicated region body
PF: predicated region fallthrough
CT: control target
= control target key end

     0   :  { %9 = vsyncpa [#allocation3], 0  ;;  %s443_s0 = inlined_call_operand.hbm [shape: f32[2,5], index: 0, kind: input, shape index: {}]   ;;  %s444_s1 = inlined_call_operand.hbm [shape: f32[160,128], index: 1, kind: input, shape index: {}]   ;;  %s445_s2 = inlined_call_operand.vmem [shape: f32[1,3], index: 2, kind: output, shape index: {0}]   ;;  %s446_s3 = inlined_call_operand.hbm [shape: f32[1,1], index: 3, kind: output, shape index: {1}]  }
   0x1   :  { %10 = vsyncpa [#allocation6], 0 }
   0x2   :  { %11 = vsyncpa [#allocation4], 0  ;;  %s17_s14 = sshll.u32 %s443_s0, 4  ;;  %s382_s15 = smov [#allocation2]   ;;  %s18_s14 = int_to_ptr.hbm [resolvable:$true] %s17_s14 }
   0x3   :  { %s19_s16 = sshll.u32 %s382_s15, 4  ;;  %s27_s19 = sshll.u32 %s444_s1, 4  ;;  %s20_s16 = int_to_ptr.vmem [resolvable:$true] %s19_s16  ;;  %s28_s19 = int_to_ptr.hbm [resolvable:$true] %s27_s19 }
   0x4   :  { %22 = dma.hbm_to_vmem [thread:$0]  %s18_s14, 32, %s20_s16, [#allocation3]  }
   0x5   :  { %s383_s20 = smov [#allocation5]   ;;  %s384_s22 = smov 128  }
   0x6   :  { %s29_s21 = sshll.u32 %s383_s20, 4  ;;  %s385_s23 = smov 8   ;;  %s30_s21 = int_to_ptr.vmem [resolvable:$true] %s29_s21 }
   0x7   :  { %35 = dma.hbm_to_vmem [thread:$0]  %s28_s19, 2560, %s30_s21, [#allocation6], %s384_s22, %s384_s22, %s385_s23  }
   0x8   :  { %376 = dma.done.wait [#allocation3], 32  }
   0x9   :  { %377 = vsyncadd [#allocation3], 4294967264 }
   0xa   :  { %378 = dma.done.wait [#allocation6], 2560  }
   0xb   :  { %379 = vsyncadd [#allocation6], 4294964736  ;;  %v386_v0 = vmov 0   ;;  %v387_v1 = vmov 2   ;;  %v388_v2 = vmov 4   ;;  %v389_v4 = vmov 1  }
   0xc   :  { %297 = vset.pattern.permute.xlu0 %v386_v0  ;;  %299 = vset.pattern.permute.xlu1 %v387_v1  ;;  %v419_v3 = vld [vmem:[#allocation2] sm:$0x3]  ;;  %v390_v5 = vmov 3   ;;  %v87_v6 = vld [vmem:[#allocation5 + $0x20] sm:$0xf]  ;;  %vm94_vm0 = vcmask 1043456  }
   0xd   :  { %301 = vset.pattern.permute.xlu2 %v388_v2  ;;  %49 = vperm.xlu0 %297, %v419_v3   ;;  %v86_v7 = vld [vmem:[#allocation5 + $0x18] sm:$0xff]  ;;  %v85_v8 = vld [vmem:[#allocation5 + $0x10] sm:$0xff]  ;;  %v45_v9 = vld [vmem:[#allocation5] sm:$0x1f]  ;;  %vm90_vm1 = vcmask 162816   ;;  %vm150_vm2 = vcmask 16384  }
   0xe   :  { %64 = vperm.xlu1 %299, %v419_v3   ;;  %78 = vperm.xlu2 %301, %v419_v3   ;;  %v52_v12 = vperm.slane %v45_v9, 0  ;;  %v306_v13 = vld [vmem:[#allocation5 + $0x8] ss:$0 sm:$0xff]  ;;  %v60_v15 = vperm.slane %v45_v9, 1  ;;  %v67_v16 = vperm.slane %v45_v9, 2  ;;  %v74_v17 = vperm.slane %v45_v9, 3 }
   0xf   :  { %277 = vmatpush.msk.msra.mxu0 %vm94_vm0, %v87_v6  ;;  %v81_v22 = vperm.slane %v45_v9, 4  ;;  %v121_v32 = vld [vmem:[#allocation5 + $0x40] sm:$0xf]  ;;  %v120_v33 = vld [vmem:[#allocation5 + $0x38] sm:$0xff]  ;;  %v119_v34 = vld [vmem:[#allocation5 + $0x30] sm:$0xff]  ;;  %vm243_vm3 = vcmask 33792  }
  0x10   :  { %279 = vmatpush.msk.msra.mxu1 %vm94_vm0, %v121_v32  ;;  %v307_v35 = vld [vmem:[#allocation5 + $0x28] ss:$0 sm:$0xff]  ;;  %v180_v42 = vld [vmem:[#allocation5 + $0x70] sm:$0xf]  ;;  %v178_v44 = vld [vmem:[#allocation5 + $0x60] sm:$0xff]  ;;  %s263_s25 = sshll.u32 %s446_s3, 4  ;;  %s264_s25 = int_to_ptr.hbm [resolvable:$true] %s263_s25 }
  0x11   :  { %112 = vmatpush.msra.mxu0 %v86_v7  ;;  %v308_v39 = vld [vmem:[#allocation5 + $0x48] ss:$0 sm:$0xff]  ;;  %281 = vmatpush.msk.msra.mxu2 %vm94_vm0, %v180_v42  ;;  %v152_v45 = vld [vmem:[#allocation5 + $0x50] sm:$0x7]  ;;  %v309_v48 = vld [vmem:[#allocation5 + $0x58] ss:$0 sm:$0xff] }
  0x12   :  { %144 = vmatpush.msra.mxu1 %v120_v33  ;;  %v179_v43 = vld [vmem:[#allocation5 + $0x68] sm:$0xff]  ;;  %v159_v47 = vperm.slane %v152_v45, 0  ;;  %v167_v50 = vperm.slane %v152_v45, 1  ;;  %v174_v51 = vperm.slane %v152_v45, 2  ;;  %v212_v60 = vld [vmem:[#allocation5 + $0x90] sm:$0xf] }
  0x13   :  { %113 = vmatpush.msra.mxu0 %v85_v8  ;;  %203 = vmatpush.msra.mxu2 %v179_v43  ;;  %v211_v61 = vld [vmem:[#allocation5 + $0x88] sm:$0xff]  ;;  %v210_v62 = vld [vmem:[#allocation5 + $0x80] sm:$0xff]  ;;  %v310_v63 = vld [vmem:[#allocation5 + $0x78] ss:$0 sm:$0xff]  ;;  %s391_s27 = smov [#allocation7]  }
  0x14   :  { %145 = vmatpush.msra.mxu1 %v119_v34  ;;  %283 = vmatpush.msk.msra.mxu3 %vm94_vm0, %v212_v60 }
  0x15   :  { %298 = vset.pattern.permute.xlu0 %v389_v4  ;;  %204 = vmatpush.msra.mxu2 %v178_v44 }
  0x16   :  { %300 = vset.pattern.permute.xlu1 %v390_v5  ;;  %57 = vperm.xlu0 %298, %v419_v3  }
  0x17   :  { %71 = vperm.xlu1 %300, %v419_v3   ;;  %302 = vset.pattern.permute.xlu2 %v386_v0 }
  0x18   :  { %235 = vmatpush.msra.mxu3 %v211_v61 }
  0x1a   :  { %236 = vmatpush.msra.mxu3 %v210_v62 }
  0x1e   :  { %305 = vset.pattern.permute.xlu0 %v387_v1 }
  0x1f   :  { %303 = vset.pattern.permute.xlu1 %v389_v4  ;;  %v311_v4 = vld [vmem:[#allocation5 + $0x98] ss:$0 sm:$0xff] }
  0x68   :  { %v79_v23 = vpop.permute.xlu2 %78 }
  0x69   :  { %v82_v28 = vmul.f32 %v81_v22, %v79_v23 }
  0x7f   :  { %v50_v10 = vpop.permute.xlu0 %49 }
  0x80   :  { %v65_v11 = vpop.permute.xlu1 %64  ;;  %v53_v14 = vmul.f32 %v52_v12, %v50_v10 }
  0x81   :  { %v68_v24 = vmul.f32 %v67_v16, %v65_v11 }
  0x82   :  { %v55_v20 = vadd.f32 %v306_v13, %v53_v14 }
  0x88   :  { %v58_v18 = vpop.permute.xlu0 %57 }
  0x89   :  { %v72_v19 = vpop.permute.xlu1 %71  ;;  %v61_v21 = vmul.f32 %v60_v15, %v58_v18 }
  0x8a   :  { %v75_v26 = vmul.f32 %v74_v17, %v72_v19 }
  0x8b   :  { %v62_v25 = vadd.f32 %v61_v21, %v55_v20 }
  0x8d   :  { %v69_v27 = vadd.f32 %v68_v24, %v62_v25 }
  0x8f   :  { %v76_v29 = vadd.f32 %v75_v26, %v69_v27 }
  0x91   :  { %v83_v30 = vadd.f32 %v82_v28, %v76_v29 }
  0x93   :  { %312 = vtanh.f32 %v83_v30 }
  0x99   :  { %v313_v31 = vpop.eup %312 }
  0x9a   :  { %278 = vmatmul.msk.f32.vlgmr.msra.gmra.mxu0 %vm90_vm1, %v313_v31 }
 0x117   :  { %v115_v36 = vpop.f32.mrf.mxu0 }
 0x118   :  { %v116_v37 = vadd.f32 %v307_v35, %v115_v36 }
 0x11a   :  { %314 = vtanh.f32 %v116_v37 }
 0x120   :  { %v315_v38 = vpop.eup %314 }
 0x121   :  { %280 = vmatmul.msk.f32.vlgmr.msra.gmra.mxu1 %vm90_vm1, %v315_v38 }
 0x19e   :  { %v147_v40 = vpop.f32.mrf.mxu1 }
 0x19f   :  { %v148_v41 = vadd.f32 %v308_v39, %v147_v40 }
 0x1a1   :  { %151 = vst.msk [vmem:[%s445_s2] sm:$0x1] %vm150_vm2, %v148_v41  ;;  %164 = vperm.xlu1 %303, %v148_v41   ;;  %156 = vperm.xlu2 %302, %v148_v41  }
 0x1a9   :  { %304 = vset.pattern.permute.xlu2 %v387_v1 }
 0x1aa   :  { %171 = vperm.xlu2 %304, %v148_v41  }
 0x1fb   :  { %v157_v46 = vpop.permute.xlu2 %156 }
 0x1fc   :  { %v160_v49 = vmul.f32 %v159_v47, %v157_v46 }
 0x1fe   :  { %v162_v54 = vadd.f32 %v309_v48, %v160_v49 }
 0x204   :  { %v172_v52 = vpop.permute.xlu2 %171 }
 0x205   :  { %v175_v56 = vmul.f32 %v174_v51, %v172_v52 }
 0x213   :  { %v165_v53 = vpop.permute.xlu1 %164 }
 0x214   :  { %v168_v55 = vmul.f32 %v167_v50, %v165_v53 }
 0x216   :  { %v169_v57 = vadd.f32 %v168_v55, %v162_v54 }
 0x218   :  { %v176_v58 = vadd.f32 %v175_v56, %v169_v57 }
 0x21a   :  { %v177_v59 = vmax.f32 %v176_v58, 0.0 }
 0x21c   :  { %282 = vmatmul.msk.f32.vlgmr.msra.gmra.mxu2 %vm90_vm1, %v177_v59 }
 0x29f   :  { %v206_v0 = vpop.f32.mrf.mxu2 }
 0x2a0   :  { %v207_v1 = vadd.f32 %v310_v63, %v206_v0 }
 0x2a2   :  { %v209_v2 = vmax.f32 %v207_v1, 0.0 }
 0x2a4   :  { %284 = vmatmul.msk.f32.vlgmr.msra.gmra.mxu3 %vm90_vm1, %v209_v2 }
 0x327   :  { %v238_v5 = vpop.f32.mrf.mxu3 }
 0x328   :  { %v239_v6 = vadd.f32 %v311_v4, %v238_v5 }
 0x32a   :  { %v241_v7 = vsub.f32 %v239_v6, %v419_v3 }
 0x32c   :  { %v242_v8 = vmul.f32 %v241_v7, %v241_v7 }
 0x32e   :  { %v244_v9 = vsel %vm243_vm3, %v242_v8, 0.0 }
 0x32f   :  { %245 = vadd.xlane.f32.xlu0 %v244_v9 }
 0x3a2   :  { %v246_v10 = vpop.xlane.xlu0 %245 }
 0x3a3   :  { %v247_v11 = vrot.slane %v246_v10, 4 }
 0x3a5   :  { %v248_v12 = vadd.f32 %v247_v11, %v246_v10 }
 0x3a7   :  { %v249_v13 = vrot.slane %v248_v12, 2 }
 0x3a9   :  { %v250_v14 = vadd.f32 %v249_v13, %v248_v12 }
 0x3ab   :  { %v251_v15 = vrot.slane %v250_v14, 1 }
 0x3ad   :  { %v252_v16 = vadd.f32 %v251_v15, %v250_v14 }
 0x3af   :  { %285 = vpush %v252_v16 }
 0x3e0   :  { %s286_s26 = spop %285 }
 0x3e1   :  { %255 = sst [smem:[#allocation7]] %s286_s26 }
 0x3e2   :  { %266 = dma.smem_to_hbm %s391_s27, 16, %s264_s25, [#allocation4]  }
 0x3e3   :  { %380 = dma.done.wait [#allocation4], 16  }
 0x3e4   :  { %381 = vsyncadd [#allocation4], 4294967280 }
 0x3e5   :  { %273 = sfence }
 0x3e6   :  { %274 = vsyncpa [#allocation3], 1 }
 0x3e7   :  { %275 = vsyncpa [#allocation6], 1 }
 0x3e8   :  { %276 = vsyncpa [#allocation4], 1 }

</bundles_post_ra>
